<compile_context>
chip_gen: v7x
topology: tpu7x:2x2x1
jax: 0.10.0
libtpu: 0.0.40
codegen_flags: <defaults>
</compile_context>

<pallas_src>
import functools

import jax
import jax.numpy as jnp
from jax.experimental import pallas as pl
from jax.experimental.pallas import tpu as pltpu

_MIB = 1024 * 1024


# --------------------------------------------------------------------------- helpers
def _layer_norm(x, w, b, eps=1e-5):
    mu = jnp.mean(x, axis=-1, keepdims=True)
    var = jnp.mean((x - mu) ** 2, axis=-1, keepdims=True)
    return (x - mu) * jax.lax.rsqrt(var + eps) * w + b


def _vmem_capacity_bytes():
    """Per-core VMEM capacity; generation-aware tiling/limits derive from this."""
    try:
        return int(pltpu.get_tpu_info().vmem_capacity_bytes)
    except Exception:
        return 128 * _MIB          # v5e/v6e figure; keeps conservative defaults


def _vmem_limit(est_bytes, cap_bytes):
    # Generous margin over the estimated working set, floored above the scoped default,
    # capped at 3/4 of physical capacity. If 2*est ever hits the cap, the right fix is
    # smaller tiles, not a bigger limit.
    return int(min(max(2 * est_bytes, 32 * _MIB), (3 * cap_bytes) // 4))


def _const_spec(shape, single_buffer):
    """Whole-array block with a grid-constant index (weights / biases).
    single_buffer=True drops the second pipeline buffer (constants are only DMA'd once),
    halving constant-weight VMEM residency — the main v7x (64 MiB VMEM) knob."""
    nd = len(shape)
    idx = lambda *_, _nd=nd: (0,) * _nd
    if single_buffer:
        try:
            return pl.BlockSpec(shape, idx, pipeline_mode=pl.Buffered(1))
        except TypeError:          # older jax without BlockSpec.pipeline_mode
            pass
    return pl.BlockSpec(shape, idx)


# ---------------------------------------------------------------------------
# kernel 1: q,k,v = ln1(x_rows) @ w_in + b_in        (row tile of N*L rows)
# ---------------------------------------------------------------------------
def _ln_qkv_kernel(x_ref, ln1_w_ref, ln1_b_ref, w_in_ref, b_in_ref,
                   q_ref, k_ref, v_ref):
    x = x_ref[...].astype(jnp.float32)                    # (RT, D)
    D = x.shape[-1]
    h = _layer_norm(x, ln1_w_ref[...], ln1_b_ref[...])
    # bf16 operands, f32 accumulation on the MXU; 1/sqrt(hd) already folded into w_in/b_in.
    qkv = jnp.dot(h.astype(jnp.bfloat16), w_in_ref[...],
                  preferred_element_type=jnp.float32) + b_in_ref[...]   # (RT, 3D)
    q_ref[...] = qkv[:, 0 * D:1 * D].astype(q_ref.dtype)
    k_ref[...] = qkv[:, 1 * D:2 * D].astype(k_ref.dtype)
    v_ref[...] = qkv[:, 2 * D:3 * D].astype(v_ref.dtype)


# ---------------------------------------------------------------------------
# kernel 2: flash attention (online softmax over kv tiles) + out_proj + residual
#   grid = (batch, q_tiles, kv_tiles);  kv axis is the innermost "arbitrary" axis
# ---------------------------------------------------------------------------
def _flash_attn_kernel(q_ref, k_ref, v_ref, x_ref,
                       w_out_ref, b_out_ref, gamma1_ref,
                       o_ref,
                       m_sc, l_sc, acc_sc, attn_sc,
                       *, n_head: int):
    ki = pl.program_id(2)
    n_k = pl.num_programs(2)

    @pl.when(ki == 0)
    def _():
        m_sc[...] = jnp.full_like(m_sc, -jnp.inf)
        l_sc[...] = jnp.zeros_like(l_sc)
        acc_sc[...] = jnp.zeros_like(acc_sc)

    TQ, D = q_ref.shape[1], q_ref.shape[2]
    TK = k_ref.shape[1]
    hd = D // n_head

    # Static lane slices + stack -> (H, T, hd); the heavy math below is one batched
    # einsum over all heads (no per-head (L,L) tensors kept live).
    q2, k2, v2 = q_ref[0], k_ref[0], v_ref[0]              # bf16 (T, D)
    qh = jnp.stack([q2[:, h * hd:(h + 1) * hd] for h in range(n_head)])   # (H, TQ, hd)
    kh = jnp.stack([k2[:, h * hd:(h + 1) * hd] for h in range(n_head)])   # (H, TK, hd)
    vh = jnp.stack([v2[:, h * hd:(h + 1) * hd] for h in range(n_head)])   # (H, TK, hd)

    # scores for this kv tile, f32 on the MXU (scale pre-folded into w_in)
    s = jnp.einsum("hqd,hkd->hqk", qh, kh,
                   preferred_element_type=jnp.float32)      # (H, TQ, TK)

    m_prev = m_sc[...]
    m_new = jnp.maximum(m_prev, jnp.max(s, axis=-1, keepdims=True))
    alpha = jnp.exp(m_prev - m_new)
    p = jnp.exp(s - m_new)
    l_sc[...] = alpha * l_sc[...] + jnp.sum(p, axis=-1, keepdims=True)
    acc_sc[...] = alpha * acc_sc[...] + jnp.einsum(
        "hqk,hkd->hqd", p.astype(jnp.bfloat16), vh,
        preferred_element_type=jnp.float32)
    m_sc[...] = m_new

    @pl.when(ki == n_k - 1)
    def _():
        inv_l = pl.reciprocal(l_sc[...], approx=True)       # EUP slot, off the VALU path
        for h in range(n_head):                             # static lane-offset bf16 stores
            attn_sc[:, h * hd:(h + 1) * hd] = (acc_sc[h] * inv_l[h]).astype(attn_sc.dtype)
        out = jnp.dot(attn_sc[...], w_out_ref[...],
                      preferred_element_type=jnp.float32) + b_out_ref[...]
        x = x_ref[0].astype(jnp.float32)
        o_ref[0] = (x + gamma1_ref[...] * out).astype(o_ref.dtype)


# ---------------------------------------------------------------------------
# kernel 3: x2 = x1 + gamma2 * c_proj(QuickGELU(c_fc(ln2(x1))))   (row tile)
# ---------------------------------------------------------------------------
def _mlp_kernel(x_ref, ln2_w_ref, ln2_b_ref, w_fc_ref, b_fc_ref,
                w_proj_ref, b_proj_ref, gamma2_ref, o_ref):
    x = x_ref[...].astype(jnp.float32)
    h = _layer_norm(x, ln2_w_ref[...], ln2_b_ref[...])
    u = jnp.dot(h.astype(jnp.bfloat16), w_fc_ref[...],
                preferred_element_type=jnp.float32) + b_fc_ref[...]       # (RT, Dh)
    # QuickGELU kept f32 (v5e has no bf16 VPU/EUP path).
    # TODO(synk): on v6e/v7x this intermediate could be bf16 to halve vreg/VMEM pressure.
    u = u * jax.nn.sigmoid(1.702 * u)
    m = jnp.dot(u.astype(jnp.bfloat16), w_proj_ref[...],
                preferred_element_type=jnp.float32) + b_proj_ref[...]     # (RT, D)
    o_ref[...] = (x + gamma2_ref[...] * m).astype(o_ref.dtype)


# ---------------------------------------------------------------------------
# wrappers
# ---------------------------------------------------------------------------
def _pad_rows(a, rt):
    rem = a.shape[0] % rt
    if rem:
        a = jnp.pad(a, ((0, rt - rem), (0, 0)))
    return a


def residual_attention_block_nld(x_nld, params, *, n_head: int,
                                 q_tile: int = 256, kv_tile: int = 512,
                                 row_tile=None, weight_dtype=jnp.bfloat16,
                                 single_buffer_weights=None):
    """Forward pass on (N, L, D) activations (preferred entry point)."""
    N, L, D = x_nld.shape
    assert D % n_head == 0, "d_model must be divisible by n_head"
    hd = D // n_head
    Dh = params["w_fc"].shape[0]
    f32 = jnp.float32

    cap = _vmem_capacity_bytes()
    if single_buffer_weights is None:
        # Single-buffer grid-constant weights on small-VMEM parts (v7x: 64 MiB/core).
        single_buffer_weights = cap <= 72 * _MIB
    if row_tile is None:
        # Bigger row tiles on 128-MiB-VMEM parts (v5e/v6e) amortize per-grid-step
        # overhead; 256 keeps v7x comfortably within budget.
        row_tile = 512 if cap >= 96 * _MIB else 256
    cspec = functools.partial(_const_spec, single_buffer=single_buffer_weights)

    # ---- one-time weight prep (pure XLA, outside the kernels) -------------------
    # pre-transpose so every in-kernel matmul is act @ W; cast matmul weights to bf16;
    # fold the 1/sqrt(head_dim) softmax scale into the q slice of the input projection.
    scale = 1.0 / float(hd) ** 0.5
    qscale = jnp.concatenate([jnp.full((D,), scale, f32), jnp.ones((2 * D,), f32)])
    w_in_t = (params["w_in"].T.astype(f32) * qscale[None, :]).astype(weight_dtype)  # (D, 3D)
    b_in = (params["b_in"].astype(f32) * qscale).reshape(1, 3 * D)

    w_out_t = params["w_out"].T.astype(weight_dtype)      # (D, D)
    w_fc_t = params["w_fc"].T.astype(weight_dtype)        # (D, Dh)
    w_proj_t = params["w_proj"].T.astype(weight_dtype)    # (Dh, D)

    r2 = lambda a: a.reshape(1, -1).astype(f32)
    ln1_w, ln1_b = r2(params["ln1_w"]), r2(params["ln1_b"])
    ln2_w, ln2_b = r2(params["ln2_w"]), r2(params["ln2_b"])
    b_out, b_fc, b_proj = r2(params["b_out"]), r2(params["b_fc"]), r2(params["b_proj"])
    gamma1, gamma2 = r2(params["gamma1"]), r2(params["gamma2"])

    R = N * L
    rt = min(row_tile, R)

    # ----------------- call 1: LN1 + fused QKV projection (row-tiled) -----------------
    x_rows = _pad_rows(x_nld.reshape(R, D), rt)
    Rp = x_rows.shape[0]
    qkv_consts = (ln1_w, ln1_b, w_in_t, b_in)
    est_qkv = 2 * w_in_t.size * 2 + 4 * 2 * 2 * rt * D + 2 * 2 * 3 * rt * D + 4 * rt * 4 * D
    q_rows, k_rows, v_rows = pl.pallas_call(
        _ln_qkv_kernel,
        out_shape=(jax.ShapeDtypeStruct((Rp, D), jnp.bfloat16),) * 3,
        grid_spec=pltpu.PrefetchScalarGridSpec(
            num_scalar_prefetch=0,
            grid=(Rp // rt,),
            in_specs=[pl.BlockSpec((rt, D), lambda i: (i, 0))]
                     + [cspec(c.shape) for c in qkv_consts],
            out_specs=(pl.BlockSpec((rt, D), lambda i: (i, 0)),) * 3),
        compiler_params=pltpu.CompilerParams(
            dimension_semantics=("parallel",),
            vmem_limit_bytes=_vmem_limit(est_qkv, cap)),
    )(x_rows, *qkv_consts)
    if Rp != R:
        q_rows, k_rows, v_rows = q_rows[:R], k_rows[:R], v_rows[:R]
    q_nld = q_rows.reshape(N, L, D)
    k_nld = k_rows.reshape(N, L, D)
    v_nld = v_rows.reshape(N, L, D)

    # ----------------- call 2: flash attention + out-proj + residual -----------------
    TQ = q_tile if (L >= q_tile and L % q_tile == 0) else L
    TK = kv_tile if (L >= kv_tile and L % kv_tile == 0) else L
    # TODO(synk): support ragged L with masked edge kv/q tiles instead of TQ=TK=L fallback.
    nQ, nK = L // TQ, L // TK
    attn_consts = (w_out_t, b_out, gamma1)
    est_attn = (2 * 2 * w_out_t.size                      # out-proj weight
                + 2 * 2 * (TQ + 2 * TK) * D               # q/k/v bf16 pipeline buffers
                + 2 * 4 * 2 * TQ * D                      # x in / x1 out f32 buffers
                + 4 * n_head * TQ * (TK + hd + 4)         # f32 scores + accumulators
                + 2 * n_head * (TQ + 2 * TK) * hd + 2 * TQ * D)
    x1 = pl.pallas_call(
        functools.partial(_flash_attn_kernel, n_head=n_head),
        out_shape=jax.ShapeDtypeStruct((N, L, D), x_nld.dtype),
        grid_spec=pltpu.PrefetchScalarGridSpec(
            num_scalar_prefetch=0,
            grid=(N, nQ, nK),
            in_specs=[pl.BlockSpec((1, TQ, D), lambda b, qi, ki: (b, qi, 0)),
                      pl.BlockSpec((1, TK, D), lambda b, qi, ki: (b, ki, 0)),
                      pl.BlockSpec((1, TK, D), lambda b, qi, ki: (b, ki, 0)),
                      pl.BlockSpec((1, TQ, D), lambda b, qi, ki: (b, qi, 0))]
                     + [cspec(c.shape) for c in attn_consts],
            out_specs=pl.BlockSpec((1, TQ, D), lambda b, qi, ki: (b, qi, 0)),
            scratch_shapes=[pltpu.VMEM((n_head, TQ, 1), jnp.float32),    # running max
                            pltpu.VMEM((n_head, TQ, 1), jnp.float32),    # running sum
                            pltpu.VMEM((n_head, TQ, hd), jnp.float32),   # f32 accumulator
                            pltpu.VMEM((TQ, D), jnp.bfloat16)]),         # packed head outs
        compiler_params=pltpu.CompilerParams(
            dimension_semantics=("parallel", "parallel", "arbitrary"),
            vmem_limit_bytes=_vmem_limit(est_attn, cap)),
    )(q_nld, k_nld, v_nld, x_nld, *attn_consts)

    # ----------------- call 3: MLP + residual (row-tiled) -----------------
    # TODO(synk): on 128-MiB-VMEM parts (v5e/v6e) calls 2+3 could be fused to avoid the
    # x1 HBM round trip; kept split so both weight sets are never co-resident on v7x.
    x1_rows = _pad_rows(x1.reshape(R, D), rt)
    Rp2 = x1_rows.shape[0]
    mlp_consts = (ln2_w, ln2_b, w_fc_t, b_fc, w_proj_t, b_proj, gamma2)
    est_mlp = (2 * 2 * (w_fc_t.size + w_proj_t.size)
               + 4 * 2 * 2 * rt * D + 4 * (2 * rt * Dh + 2 * rt * D))
    x2_rows = pl.pallas_call(
        _mlp_kernel,
        out_shape=jax.ShapeDtypeStruct((Rp2, D), x_nld.dtype),
        grid_spec=pltpu.PrefetchScalarGridSpec(
            num_scalar_prefetch=0,
            grid=(Rp2 // rt,),
            in_specs=[pl.BlockSpec((rt, D), lambda i: (i, 0))]
                     + [cspec(c.shape) for c in mlp_consts],
            out_specs=pl.BlockSpec((rt, D), lambda i: (i, 0))),
        compiler_params=pltpu.CompilerParams(
            dimension_semantics=("parallel",),
            vmem_limit_bytes=_vmem_limit(est_mlp, cap)),
    )(x1_rows, *mlp_consts)
    if Rp2 != R:
        x2_rows = x2_rows[:R]
    return x2_rows.reshape(N, L, D)


def residual_attention_block(x_lnd, params, *, n_head: int, **kw):
    """(L, N, D) entry point matching nn.MultiheadAttention's default layout.
    The two transposes are HBM passes over the activations; prefer the (N, L, D)
    entry point upstream when the surrounding model allows it."""
    x_nld = jnp.transpose(x_lnd, (1, 0, 2))
    out = residual_attention_block_nld(x_nld, params, n_head=n_head, **kw)
    return jnp.transpose(out, (1, 0, 2))


# ---------------------------------------------------------------------------
# params + pure-JAX reference (for the sanity check)
# ---------------------------------------------------------------------------
def init_params(key, d_model, n_head, expand_ratio=4):
    Dh = int(d_model * expand_ratio)
    ks = jax.random.split(key, 8)
    s = 0.02
    # init_values=None in the reference module -> gamma_1 = gamma_2 = 1.0
    return {
        "w_in":   jax.random.normal(ks[0], (3 * d_model, d_model), jnp.float32) * s,
        "b_in":   jax.random.normal(ks[1], (3 * d_model,), jnp.float32) * s,
        "w_out":  jax.random.normal(ks[2], (d_model, d_model), jnp.float32) * s,
        "b_out":  jax.random.normal(ks[3], (d_model,), jnp.float32) * s,
        "ln1_w":  jnp.ones((d_model,), jnp.float32),
        "ln1_b":  jnp.zeros((d_model,), jnp.float32),
        "ln2_w":  jnp.ones((d_model,), jnp.float32),
        "ln2_b":  jnp.zeros((d_model,), jnp.float32),
        "w_fc":   jax.random.normal(ks[4], (Dh, d_model), jnp.float32) * s,
        "b_fc":   jax.random.normal(ks[5], (Dh,), jnp.float32) * s,
        "w_proj": jax.random.normal(ks[6], (d_model, Dh), jnp.float32) * s,
        "b_proj": jax.random.normal(ks[7], (d_model,), jnp.float32) * s,
        "gamma1": jnp.ones((d_model,), jnp.float32),
        "gamma2": jnp.ones((d_model,), jnp.float32),
    }


def _reference_jax(x_lnd, params, n_head, weight_dtype=jnp.bfloat16):
    """f32 reference mirroring the PyTorch module; matmul weights are rounded through
    `weight_dtype` so the comparison with the bf16-weight kernel isolates
    accumulation-order / activation-cast differences."""
    L, N, D = x_lnd.shape
    hd = D // n_head
    rnd = lambda w: w.astype(weight_dtype).astype(jnp.float32)

    def ln(x, w, b):
        mu = x.mean(-1, keepdims=True)
        var = ((x - mu) ** 2).mean(-1, keepdims=True)
        return (x - mu) / jnp.sqrt(var + 1e-5) * w + b

    h1 = ln(x_lnd, params["ln1_w"], params["ln1_b"])
    qkv = h1 @ rnd(params["w_in"]).T + params["b_in"]
    q, k, v = jnp.split(qkv, 3, axis=-1)
    q = q * (1.0 / jnp.sqrt(hd))

    def heads(t):  # (L, N, D) -> (N, H, L, hd)
        return t.reshape(L, N, n_head, hd).transpose(1, 2, 0, 3)

    qh, kh, vh = heads(q), heads(k), heads(v)
    s = jnp.einsum("nhld,nhmd->nhlm", qh, kh)
    p = jax.nn.softmax(s, axis=-1)
    o = jnp.einsum("nhlm,nhmd->nhld", p, vh)
    o = o.transpose(2, 0, 1, 3).reshape(L, N, D)
    attn = o @ rnd(params["w_out"]).T + params["b_out"]
    x1 = x_lnd + params["gamma1"] * attn

    h2 = ln(x1, params["ln2_w"], params["ln2_b"])
    u = h2 @ rnd(params["w_fc"]).T + params["b_fc"]
    u = u * jax.nn.sigmoid(1.702 * u)
    m = u @ rnd(params["w_proj"]).T + params["b_proj"]
    return x1 + params["gamma2"] * m


if __name__ == "__main__":
    import numpy as np

    L, N, D, H = 8, 2, 32, 4          # seq, batch, d_model, n_head
    key = jax.random.PRNGKey(0)
    kx, kp = jax.random.split(key)

    x = jax.random.normal(kx, (L, N, D), jnp.float32)
    params = init_params(kp, D, H, expand_ratio=4)

    out = residual_attention_block(x, params, n_head=H)
    out = jax.block_until_ready(out)

    ref = _reference_jax(x, params, H)
    np.testing.assert_allclose(np.asarray(out), np.asarray(ref),
                               rtol=2e-2, atol=2e-2)
    print("KERNEL_OK")
</pallas_src>

<mosaic_0001>
module attributes {stable_mosaic.version = 11 : i64} {
  func.func @_ln_qkv_kernel(%arg0: i32, %arg1: memref<16x32xf32, #tpu.memory_space<vmem>>, %arg2: memref<1x32xf32, #tpu.memory_space<vmem>>, %arg3: memref<1x32xf32, #tpu.memory_space<vmem>>, %arg4: memref<32x96xbf16, #tpu.memory_space<vmem>>, %arg5: memref<1x96xf32, #tpu.memory_space<vmem>>, %arg6: memref<16x32xbf16, #tpu.memory_space<vmem>>, %arg7: memref<16x32xbf16, #tpu.memory_space<vmem>>, %arg8: memref<16x32xbf16, #tpu.memory_space<vmem>>) attributes {dimension_semantics = [#tpu.dimension_semantics<parallel>], iteration_bounds = array<i64: 1>, scalar_prefetch = 0 : i64, scratch_operands = 0 : i64, tpu.core_type = #tpu.core_type<tc>, window_params = [{transform_indices = @transform_0, window_bounds = array<i64: 16, 32>}, {pipeline_mode = #tpu.pipeline_mode<synchronous>, transform_indices = @transform_1, window_bounds = array<i64: 1, 32>}, {pipeline_mode = #tpu.pipeline_mode<synchronous>, transform_indices = @transform_2, window_bounds = array<i64: 1, 32>}, {pipeline_mode = #tpu.pipeline_mode<synchronous>, transform_indices = @transform_3, window_bounds = array<i64: 32, 96>}, {pipeline_mode = #tpu.pipeline_mode<synchronous>, transform_indices = @transform_4, window_bounds = array<i64: 1, 96>}, {transform_indices = @transform_5, window_bounds = array<i64: 16, 32>}, {transform_indices = @transform_6, window_bounds = array<i64: 16, 32>}, {transform_indices = @transform_7, window_bounds = array<i64: 16, 32>}]} {
    %c0 = arith.constant 0 : index
    %c0_0 = arith.constant 0 : index
    %0 = vector.load %arg1[%c0, %c0_0] : memref<16x32xf32, #tpu.memory_space<vmem>>, vector<16x32xf32>
    %c0_1 = arith.constant 0 : index
    %c0_2 = arith.constant 0 : index
    %1 = vector.load %arg2[%c0_1, %c0_2] : memref<1x32xf32, #tpu.memory_space<vmem>>, vector<1x32xf32>
    %c0_3 = arith.constant 0 : index
    %c0_4 = arith.constant 0 : index
    %2 = vector.load %arg3[%c0_3, %c0_4] : memref<1x32xf32, #tpu.memory_space<vmem>>, vector<1x32xf32>
    %cst = arith.constant dense<0.000000e+00> : vector<16xf32>
    %3 = vector.multi_reduction <add>, %0, %cst [1] : vector<16x32xf32> to vector<16xf32>
    %4 = vector.shape_cast %3 : vector<16xf32> to vector<16x1xf32>
    %cst_5 = arith.constant 3.200000e+01 : f32
    %5 = vector.broadcast %cst_5 : f32 to vector<16x1xf32>
    %6 = arith.divf %4, %5 : vector<16x1xf32>
    %7 = vector.broadcast %6 : vector<16x1xf32> to vector<16x32xf32>
    %8 = arith.subf %0, %7 : vector<16x32xf32>
    %9 = arith.mulf %8, %8 : vector<16x32xf32>
    %cst_6 = arith.constant dense<0.000000e+00> : vector<16xf32>
    %10 = vector.multi_reduction <add>, %9, %cst_6 [1] : vector<16x32xf32> to vector<16xf32>
    %11 = vector.shape_cast %10 : vector<16xf32> to vector<16x1xf32>
    %cst_7 = arith.constant 3.200000e+01 : f32
    %12 = vector.broadcast %cst_7 : f32 to vector<16x1xf32>
    %13 = arith.divf %11, %12 : vector<16x1xf32>
    %14 = vector.broadcast %6 : vector<16x1xf32> to vector<16x32xf32>
    %15 = arith.subf %0, %14 : vector<16x32xf32>
    %cst_8 = arith.constant 9.99999974E-6 : f32
    %16 = vector.broadcast %cst_8 : f32 to vector<16x1xf32>
    %17 = arith.addf %13, %16 : vector<16x1xf32>
    %18 = math.rsqrt %17 : vector<16x1xf32>
    %19 = vector.broadcast %18 : vector<16x1xf32> to vector<16x32xf32>
    %20 = arith.mulf %15, %19 : vector<16x32xf32>
    %21 = vector.broadcast %1 : vector<1x32xf32> to vector<16x32xf32>
    %22 = arith.mulf %20, %21 : vector<16x32xf32>
    %23 = vector.broadcast %2 : vector<1x32xf32> to vector<16x32xf32>
    %24 = arith.addf %22, %23 : vector<16x32xf32>
    %25 = arith.truncf %24 : vector<16x32xf32> to vector<16x32xbf16>
    %c0_9 = arith.constant 0 : index
    %c0_10 = arith.constant 0 : index
    %26 = vector.load %arg4[%c0_9, %c0_10] : memref<32x96xbf16, #tpu.memory_space<vmem>>, vector<32x96xbf16>
    %cst_11 = arith.constant dense<0.000000e+00> : vector<16x96xf32>
    %27 = tpu.matmul %25, %26, %cst_11 {dimension_numbers = #tpu.dot_dimension_numbers<[1], [0], [0], [1], [0, 0, 1, 1], [], []>} : vector<16x32xbf16>, vector<32x96xbf16>, vector<16x96xf32> -> vector<16x96xf32>
    %c0_12 = arith.constant 0 : index
    %c0_13 = arith.constant 0 : index
    %28 = vector.load %arg5[%c0_12, %c0_13] : memref<1x96xf32, #tpu.memory_space<vmem>>, vector<1x96xf32>
    %29 = vector.broadcast %28 : vector<1x96xf32> to vector<16x96xf32>
    %30 = arith.addf %27, %29 : vector<16x96xf32>
    %31 = vector.extract_strided_slice %30 {offsets = [0, 0], sizes = [16, 32], strides = [1, 1]} : vector<16x96xf32> to vector<16x32xf32>
    %32 = arith.truncf %31 : vector<16x32xf32> to vector<16x32xbf16>
    %c0_14 = arith.constant 0 : index
    %c0_15 = arith.constant 0 : index
    %33 = vector.load %arg6[%c0_14, %c0_15] : memref<16x32xbf16, #tpu.memory_space<vmem>>, vector<16x32xbf16>
    tpu.vector_store %arg6[%c0_14, %c0_15], %32 {strides = array<i32>} : memref<16x32xbf16, #tpu.memory_space<vmem>>, vector<16x32xbf16>,
    %34 = vector.extract_strided_slice %30 {offsets = [0, 32], sizes = [16, 32], strides = [1, 1]} : vector<16x96xf32> to vector<16x32xf32>
    %35 = arith.truncf %34 : vector<16x32xf32> to vector<16x32xbf16>
    %c0_16 = arith.constant 0 : index
    %c0_17 = arith.constant 0 : index
    %36 = vector.load %arg7[%c0_16, %c0_17] : memref<16x32xbf16, #tpu.memory_space<vmem>>, vector<16x32xbf16>
    tpu.vector_store %arg7[%c0_16, %c0_17], %35 {strides = array<i32>} : memref<16x32xbf16, #tpu.memory_space<vmem>>, vector<16x32xbf16>,
    %37 = vector.extract_strided_slice %30 {offsets = [0, 64], sizes = [16, 32], strides = [1, 1]} : vector<16x96xf32> to vector<16x32xf32>
    %38 = arith.truncf %37 : vector<16x32xf32> to vector<16x32xbf16>
    %c0_18 = arith.constant 0 : index
    %c0_19 = arith.constant 0 : index
    %39 = vector.load %arg8[%c0_18, %c0_19] : memref<16x32xbf16, #tpu.memory_space<vmem>>, vector<16x32xbf16>
    tpu.vector_store %arg8[%c0_18, %c0_19], %38 {strides = array<i32>} : memref<16x32xbf16, #tpu.memory_space<vmem>>, vector<16x32xbf16>,
    return
  }
  func.func @transform_0(%arg0: i32) -> (i32, i32) {
    %c0_i32 = arith.constant 0 : i32
    %c0_i32_0 = arith.constant 0 : i32
    return %arg0, %c0_i32 : i32, i32
  }
  func.func @transform_1(%arg0: i32) -> (i32, i32) {
    %c0_i32 = arith.constant 0 : i32
    %c0_i32_0 = arith.constant 0 : i32
    %c0_i32_1 = arith.constant 0 : i32
    return %c0_i32, %c0_i32_0 : i32, i32
  }
  func.func @transform_2(%arg0: i32) -> (i32, i32) {
    %c0_i32 = arith.constant 0 : i32
    %c0_i32_0 = arith.constant 0 : i32
    %c0_i32_1 = arith.constant 0 : i32
    return %c0_i32, %c0_i32_0 : i32, i32
  }
  func.func @transform_3(%arg0: i32) -> (i32, i32) {
    %c0_i32 = arith.constant 0 : i32
    %c0_i32_0 = arith.constant 0 : i32
    %c0_i32_1 = arith.constant 0 : i32
    return %c0_i32, %c0_i32_0 : i32, i32
  }
  func.func @transform_4(%arg0: i32) -> (i32, i32) {
    %c0_i32 = arith.constant 0 : i32
    %c0_i32_0 = arith.constant 0 : i32
    %c0_i32_1 = arith.constant 0 : i32
    return %c0_i32, %c0_i32_0 : i32, i32
  }
  func.func @transform_5(%arg0: i32) -> (i32, i32) {
    %c0_i32 = arith.constant 0 : i32
    %c0_i32_0 = arith.constant 0 : i32
    return %arg0, %c0_i32 : i32, i32
  }
  func.func @transform_6(%arg0: i32) -> (i32, i32) {
    %c0_i32 = arith.constant 0 : i32
    %c0_i32_0 = arith.constant 0 : i32
    return %arg0, %c0_i32 : i32, i32
  }
  func.func @transform_7(%arg0: i32) -> (i32, i32) {
    %c0_i32 = arith.constant 0 : i32
    %c0_i32_0 = arith.constant 0 : i32
    return %arg0, %c0_i32 : i32, i32
  }
}

</mosaic_0001>

<bundles_post_ra>
// kernel: tpu_custom_call.1
= control target key start
LH: loop header
LB: loop body
LE: loop exit
PB: predicated region body
PF: predicated region fallthrough
CT: control target
= control target key end

     0   :  { %13 = vsyncpa [#allocation3], 0  ;;  %s549_s0 = inlined_call_operand.hbm [shape: f32[16,32], index: 0, kind: input, shape index: {}]   ;;  %s550_s1 = inlined_call_operand.vmem [shape: f32[1,32], index: 1, kind: input, shape index: {}]   ;;  %s551_s2 = inlined_call_operand.vmem [shape: f32[1,32], index: 2, kind: input, shape index: {}]   ;;  %s552_s3 = inlined_call_operand.hbm [shape: bf16[32,96], index: 3, kind: input, shape index: {}]   ;;  %s553_s4 = inlined_call_operand.vmem [shape: f32[1,96], index: 4, kind: input, shape index: {}]   ;;  %s554_s5 = inlined_call_operand.hbm [shape: bf16[16,32], index: 5, kind: output, shape index: {0}]   ;;  %s555_s6 = inlined_call_operand.hbm [shape: bf16[16,32], index: 6, kind: output, shape index: {1}]   ;;  %s556_s7 = inlined_call_operand.hbm [shape: bf16[16,32], index: 7, kind: output, shape index: {2}]  }
   0x1   :  { %14 = vsyncpa [#allocation6], 0 }
   0x2   :  { %15 = vsyncpa [#allocation4], 0 }
   0x3   :  { %16 = vsyncpa [#allocation9], 0  ;;  %s403_s24 = smov [#allocation2]   ;;  %s285_s28 = scalar_lea.hbm %s549_s0, 256 }
   0x4   :  { %s22_s25 = sshll.u32 %s403_s24, 4  ;;  %p286_p0 = scmp.ne.s32.totalorder %s549_s0, %s285_s28  ;;  %s23_s25 = int_to_ptr.vmem [resolvable:$true] %s22_s25 }
   0x5   :  { %p289_p1 = scmp.lt.u32.totalorder %s285_s28, %s549_s0 }
   0x7   :  { %p291_p2 = pnand %p289_p1, %p286_p0 }
   0x9   :  { %294 = shalt.err (!%p291_p2)
}
   0xa   :  { %s295_s10 = scalar_lea.vmem %s23_s25, 256  ;;  %p300_p4 = scmp.lt.s32.totalorder %s23_s25, %s23_s25 }
   0xb   :  { %p296_p3 = scmp.ne.s32.totalorder %s23_s25, %s295_s10  ;;  %p301_p5 = scmp.lt.s32.totalorder %s295_s10, %s295_s10 }
   0xd   :  { %p302_p6 = por %p301_p5, %p300_p4 }
   0xf   :  { %p303_p7 = pnand %p302_p6, %p296_p3 }
  0x11   :  { %306 = shalt.err (!%p303_p7)
}
  0x12   :  { %s404_s11 = smov 128   ;;  %s405_s12 = smov 8  }
  0x13   :  { %28 = dma.hbm_to_vmem [thread:$0]  %s549_s0, 256, %s23_s25, [#allocation3], %s404_s11, %s404_s11, %s405_s12  }
  0x14   :  { %s406_s15 = smov [#allocation5]   ;;  %s307_s19 = scalar_lea.hbm %s552_s3, 256 }
  0x15   :  { %s38_s16 = sshll.u32 %s406_s15, 4  ;;  %p308_p8 = scmp.ne.s32.totalorder %s552_s3, %s307_s19  ;;  %s39_s16 = int_to_ptr.vmem [resolvable:$true] %s38_s16 }
  0x16   :  { %p311_p9 = scmp.lt.u32.totalorder %s307_s19, %s552_s3 }
  0x18   :  { %p313_p10 = pnand %p311_p9, %p308_p8 }
  0x1a   :  { %316 = shalt.err (!%p313_p10)
}
  0x1b   :  { %s317_s24 = scalar_lea.vmem %s39_s16, 256  ;;  %p322_p12 = scmp.lt.s32.totalorder %s39_s16, %s39_s16 }
  0x1c   :  { %p318_p11 = scmp.ne.s32.totalorder %s39_s16, %s317_s24  ;;  %p323_p13 = scmp.lt.s32.totalorder %s317_s24, %s317_s24 }
  0x1e   :  { %p324_p0 = por %p323_p13, %p322_p12 }
  0x20   :  { %p325_p1 = pnand %p324_p0, %p318_p11 }
  0x22   :  { %328 = shalt.err (!%p325_p1)
}
  0x23   :  { %s407_s0 = smov 64   ;;  %s408_s25 = smov 4  }
  0x24   :  { %44 = dma.hbm_to_vmem [thread:$0]  %s552_s3, 256, %s39_s16, [#allocation6], %s407_s0, %s407_s0, %s408_s25  }
  0x25   :  { %395 = dma.done.wait [#allocation3], 256  }
  0x26   :  { %396 = vsyncadd [#allocation3], 4294967040 }
  0x27   :  { %397 = dma.done.wait [#allocation6], 256  }
  0x28   :  { %398 = vsyncadd [#allocation6], 4294967040  ;;  %vm58_vm0 = vcmask 261120   ;;  %v54_v0 = vld [vmem:[#allocation2] sm:$0xff]  ;;  %v55_v1 = vld [vmem:[#allocation2 + $0x8] sm:$0xff]  ;;  %v409_v15 = vmov 0.0  }
  0x29   :  { %v59_v2 = vsel %vm58_vm0, %v54_v0, 0.0  ;;  %v62_v3 = vsel %vm58_vm0, %v55_v1, 0.0  ;;  %v279_v14 = vld [vmem:[#allocation5] sm:$0xff]   ;;  %259 = vmatprep.subr.bf16.mxu0 %v409_v15  ;;  %v280_v16 = vld [vmem:[#allocation5 + $0x8] sm:$0xff]   ;;  %vm410_vm1 = vmmov 0   ;;  %vm178_vm2 = vcmask 257024  }
  0x2a   :  { %60 = vadd.xlane.f32.xlu0 %v59_v2  ;;  %260 = vmatpush3.bf16.msra.mxu0 %v279_v14  ;;  %v246_v25 = vld [vmem:[%s550_s1] ss:$0 sm:$0xff]  ;;  %s411_s1 = smov [#allocation7]  }
  0x2b   :  { %263 = vmatprep.mubr.msk.bf16.mxu0 %vm410_vm1, %v409_v15  ;;  %261 = vmatprep.subr.bf16.mxu0 %v409_v15  ;;  %v247_v29 = vld [vmem:[%s551_s2] ss:$0 sm:$0xff]  ;;  %s202_s10 = sshll.u32 %s411_s1, 4  ;;  %s412_s2 = smov 96   ;;  %s203_s10 = int_to_ptr.vmem [resolvable:$true] %s202_s10 }
  0x2c   :  { %v248_v34 = vld [vmem:[%s553_s4] ss:$0 sm:$0xff]  ;;  %s329_s4 = scalar_lea.vmem %s203_s10, 128  ;;  %p334_p3 = scmp.lt.s32.totalorder %s203_s10, %s203_s10 }
  0x2d   :  { %p330_p2 = scmp.ne.s32.totalorder %s203_s10, %s329_s4  ;;  %p335_p4 = scmp.lt.s32.totalorder %s329_s4, %s329_s4 }
  0x2e   :  { %63 = vadd.xlane.f32.xlu0 %v62_v3  ;;  %262 = vmatpush3.bf16.msra.mxu0 %v280_v16 }
  0x2f   :  { %p336_p5 = por %p335_p4, %p334_p3 }
  0x31   :  { %p337_p6 = pnand %p336_p5, %p330_p2 }
  0xb7   :  { %v61_v4 = vpop.xlane.xlu0 %60 }
  0xb8   :  { %v66_v5 = vmul.f32 0.03125, %v61_v4 }
  0xba   :  { %v68_v6 = vsub.f32 %v54_v0, %v66_v5 }
  0xbb   :  { %v64_v7 = vpop.xlane.xlu0 %63 }
  0xbc   :  { %v67_v8 = vmul.f32 0.03125, %v64_v7  ;;  %v70_v9 = vmul.f32 %v68_v6, %v68_v6 }
  0xbe   :  { %v69_v10 = vsub.f32 %v55_v1, %v67_v8  ;;  %v72_v11 = vsel %vm58_vm0, %v70_v9, 0.0 }
  0xbf   :  { %73 = vadd.xlane.f32.xlu1 %v72_v11 }
  0xc0   :  { %v71_v12 = vmul.f32 %v69_v10, %v69_v10 }
  0xc2   :  { %v75_v13 = vsel %vm58_vm0, %v71_v12, 0.0 }
  0xc3   :  { %76 = vadd.xlane.f32.xlu1 %v75_v13 }
 0x14c   :  { %v74_v17 = vpop.xlane.xlu1 %73 }
 0x14d   :  { %v78_v18 = vmul.f32 0.03125, %v74_v17 }
 0x14f   :  { %v80_v19 = vadd.f32 1e-05, %v78_v18 }
 0x150   :  { %v77_v20 = vpop.xlane.xlu1 %76 }
 0x151   :  { %281 = vrsqrt.f32 %v80_v19  ;;  %v79_v21 = vmul.f32 0.03125, %v77_v20 }
 0x153   :  { %v81_v22 = vadd.f32 1e-05, %v79_v21 }
 0x155   :  { %283 = vrsqrt.f32 %v81_v22 }
 0x15b   :  { %v282_v23 = vpop.eup %281 }
 0x15c   :  { %v84_v24 = vmul.f32 %v282_v23, %v68_v6 }
 0x15e   :  { %v92_v28 = vmul.f32 %v246_v25, %v84_v24 }
 0x15f   :  { %v284_v26 = vpop.eup %283 }
 0x160   :  { %v85_v27 = vmul.f32 %v284_v26, %v69_v10  ;;  %v100_v31 = vadd.f32 %v247_v29, %v92_v28 }
 0x162   :  { %v93_v30 = vmul.f32 %v246_v25, %v85_v27 }
 0x164   :  { %v101_v32 = vadd.f32 %v247_v29, %v93_v30 }
 0x166   :  { %v102_v33 = vpack.c.bf16 %v101_v32, %v100_v31 }
 0x168   :  { %264 = vmatmul.mubr.msk.bf16.vlgmr.msra.gmra.mrb[0].mxu0 %vm58_vm0, %v102_v33 }
 0x23b   :  { %v163_v35 = vpop.f32.mrb[0].mxu0 }
 0x23c   :  { %v164_v36 = vadd.f32 %v248_v34, %v163_v35  ;;  %v265_v37 = vpop.f32.mrb[1].mxu0 }
 0x23d   :  { %v166_v38 = vpop.f32.mrb[2].mxu0 }
 0x23e   :  { %v254_v39 = vpack.c.bf16 %v164_v36, %v164_v36  ;;  %v167_v40 = vadd.f32 %v248_v34, %v166_v38  ;;  %v266_v41 = vpop.f32.mrb[3].mxu0 }
 0x240   :  { %v255_v42 = vpack.c.bf16 %v167_v40, %v167_v40  ;;  %189 = vrot.lane.b32.xlu1 %v254_v39, %s407_s0  ;;  %181 = vrot.lane.b32.xlu0 %v254_v39, %s412_s2  ;;  %179 = vst.msk [vmem:[#allocation7] sm:$0xf] %vm178_vm2, %v254_v39 }
 0x242   :  { %180 = vst.msk [vmem:[#allocation7 + $0x4] sm:$0xf] %vm178_vm2, %v255_v42 }
 0x243   :  { %340 = shalt.err (!%p337_p6)
}
 0x244   :  { %s341_s13 = scalar_lea.hbm %s554_s5, 128 }
 0x245   :  { %p342_p7 = scmp.ne.s32.totalorder %s554_s5, %s341_s13  ;;  %p345_p8 = scmp.lt.u32.totalorder %s341_s13, %s554_s5 }
 0x247   :  { %p347_p9 = pnand %p345_p8, %p342_p7 }
 0x249   :  { %350 = shalt.err (!%p347_p9)
}
 0x24a   :  { %208 = dma.vmem_to_hbm [thread:$0]  %s203_s10, 128, %s554_s5, [#allocation4], %s407_s0, %s407_s0, %s408_s25  }
 0x24b   :  { %183 = vrot.lane.b32.xlu1 %v255_v42, %s412_s2  ;;  %s413_s20 = smov [#allocation8]   ;;  %s414_s22 = smov [#allocation10]  }
 0x24c   :  { %s214_s21 = sshll.u32 %s413_s20, 4  ;;  %s226_s23 = sshll.u32 %s414_s22, 4  ;;  %s215_s21 = int_to_ptr.vmem [resolvable:$true] %s214_s21  ;;  %s227_s23 = int_to_ptr.vmem [resolvable:$true] %s226_s23 }
 0x24d   :  { %s351_s24 = scalar_lea.vmem %s215_s21, 128  ;;  %p356_p11 = scmp.lt.s32.totalorder %s215_s21, %s215_s21 }
 0x24e   :  { %p352_p10 = scmp.ne.s32.totalorder %s215_s21, %s351_s24  ;;  %p357_p12 = scmp.lt.s32.totalorder %s351_s24, %s351_s24 }
 0x24f   :  { %191 = vrot.lane.b32.xlu1 %v255_v42, %s407_s0 }
 0x250   :  { %p358_p13 = por %p357_p12, %p356_p11 }
 0x252   :  { %p359_p0 = pnand %p358_p13, %p352_p10 }
 0x2b2   :  { %v190_v43 = vpop.permute.xlu1 %189  ;;  %v182_v44 = vpop.permute.xlu0 %181 }
 0x2b3   :  { %195 = vst.msk [vmem:[#allocation10] sm:$0xf] %vm178_vm2, %v190_v43  ;;  %187 = vst.msk [vmem:[#allocation8] sm:$0xf] %vm178_vm2, %v182_v44 }
 0x2bd   :  { %v184_v45 = vpop.permute.xlu1 %183 }
 0x2be   :  { %188 = vst.msk [vmem:[#allocation8 + $0x4] sm:$0xf] %vm178_vm2, %v184_v45 }
 0x2bf   :  { %362 = shalt.err (!%p359_p0)
}
 0x2c0   :  { %s363_s27 = scalar_lea.hbm %s555_s6, 128 }
 0x2c1   :  { %p364_p1 = scmp.ne.s32.totalorder %s555_s6, %s363_s27  ;;  %p367_p2 = scmp.lt.u32.totalorder %s363_s27, %s555_s6 }
 0x2c3   :  { %p369_p3 = pnand %p367_p2, %p364_p1 }
 0x2c5   :  { %372 = shalt.err (!%p369_p3)
}
 0x2c6   :  { %220 = dma.vmem_to_hbm [thread:$0]  %s215_s21, 128, %s555_s6, [#allocation9], %s407_s0, %s407_s0, %s408_s25   ;;  %v192_v46 = vpop.permute.xlu1 %191 }
 0x2c7   :  { %196 = vst.msk [vmem:[#allocation10 + $0x4] sm:$0xf] %vm178_vm2, %v192_v46  ;;  %s373_s1 = scalar_lea.vmem %s227_s23, 128  ;;  %p378_p5 = scmp.lt.s32.totalorder %s227_s23, %s227_s23 }
 0x2c8   :  { %p374_p4 = scmp.ne.s32.totalorder %s227_s23, %s373_s1  ;;  %p379_p6 = scmp.lt.s32.totalorder %s373_s1, %s373_s1 }
 0x2ca   :  { %p380_p7 = por %p379_p6, %p378_p5 }
 0x2cc   :  { %p381_p8 = pnand %p380_p7, %p374_p4 }
 0x2ce   :  { %384 = shalt.err (!%p381_p8)
}
 0x2cf   :  { %s385_s4 = scalar_lea.hbm %s556_s7, 128 }
 0x2d0   :  { %p386_p9 = scmp.ne.s32.totalorder %s556_s7, %s385_s4  ;;  %p389_p10 = scmp.lt.u32.totalorder %s385_s4, %s556_s7 }
 0x2d2   :  { %p391_p11 = pnand %p389_p10, %p386_p9 }
 0x2d4   :  { %394 = shalt.err (!%p391_p11)
}
 0x2d5   :  { %232 = dma.vmem_to_hbm [thread:$0]  %s227_s23, 128, %s556_s7, [#allocation9], %s407_s0, %s407_s0, %s408_s25  }
 0x2d6   :  { %399 = dma.done.wait [#allocation4], 128  }
 0x2d7   :  { %400 = vsyncadd [#allocation4], 4294967168 }
 0x2d8   :  { %401 = dma.done.wait [#allocation9], 256  }
 0x2d9   :  { %402 = vsyncadd [#allocation9], 4294967040 }
 0x2da   :  { %242 = vsyncpa [#allocation3], 1 }
 0x2db   :  { %243 = vsyncpa [#allocation6], 1 }
 0x2dc   :  { %244 = vsyncpa [#allocation4], 1 }
 0x2dd   :  { %245 = vsyncpa [#allocation9], 1 }

</bundles_post_ra>
